<compile_context>
chip_gen: v5e
topology: v5e:2x2
jax: 0.10.0
libtpu: 0.0.40
codegen_flags: <defaults>
</compile_context>

<pallas_src>
import functools

import jax
import jax.numpy as jnp
from jax.experimental import pallas as pl
from jax.experimental.pallas import tpu as pltpu


def _ce_kernel(logits_ref, targets_ref, loss_ref, count_ref, *, hw):
    chunk = pl.program_id(1)
    inner = pl.program_id(2)
    n_inner = pl.num_programs(2)

    # output blocks are resident across the inner ("arbitrary") axis
    @pl.when(inner == 0)
    def _():
        loss_ref[...] = jnp.zeros_like(loss_ref)
        count_ref[...] = jnp.zeros_like(count_ref)

    x = logits_ref[...].astype(jnp.float32)            # (C, T) f32
    t = targets_ref[...]                                # (1, T) int32
    num_classes, tile = x.shape

    # numerically stable logsumexp over the class (sublane) axis
    m = jnp.max(x, axis=0, keepdims=True)               # (1, T)
    lse = m + jnp.log(jnp.sum(jnp.exp(x - m), axis=0, keepdims=True))

    # target-class logit via a broadcast compare against a tiny (C, 1) iota
    cls = jax.lax.broadcasted_iota(jnp.int32, (num_classes, 1), 0)
    tgt_logit = jnp.sum(jnp.where(cls == t, x, 0.0), axis=0, keepdims=True)

    # global spatial position -> ragged-tail mask; targets outside [0, C)
    # (PyTorch ignore_index=-100, segmentation 255 labels) are ignored.
    tile_idx = chunk * n_inner + inner
    pos = jax.lax.broadcasted_iota(jnp.int32, (1, tile), 1) + tile_idx * tile
    valid = (pos < hw) & (t >= 0) & (t < num_classes)

    loss = jnp.where(valid, lse - tgt_logit, 0.0)        # true select: masks
    loss_ref[...] += jnp.sum(loss, axis=1, keepdims=True)          # (1, 1)
    count_ref[...] += jnp.sum(valid.astype(jnp.float32), axis=1, keepdims=True)


def cross_entropy_loss(preds, targets, *, max_tile_hw=None):
    """preds: [N, C, H, W] float logits (f32 or bf16); targets: [N, H, W] int.

    Returns a scalar float32 == F.cross_entropy(preds, targets) with mean
    reduction over pixels whose target lies in [0, C) (others are ignored).
    """
    N, C, H, W = preds.shape
    assert targets.shape == (N, H, W)
    HW = H * W

    # native NCHW layout: (N, C, H*W); reshape only, no transpose, no padding
    logits = preds.reshape(N, C, HW)
    tgt = targets.reshape(N, 1, HW).astype(jnp.int32)

    # ---- generation-aware VMEM budget --------------------------------------
    try:
        vmem_cap = int(pltpu.get_tpu_info().vmem_capacity_bytes)
    except Exception:
        vmem_cap = 64 * 1024 * 1024          # conservative fallback (v7x-safe)
    # scoped limit: ~45 MiB on v7x (64 MiB physical), 64 MiB on v5e/v6e (128)
    vmem_limit = int(min(vmem_cap * 0.70, 64 * 1024 * 1024))
    tile_budget = int(vmem_limit * 0.75)     # headroom for compiler scratch

    in_bytes = jnp.dtype(preds.dtype).itemsize
    # Live VMEM per spatial lane of one tile:
    #   2x double-buffered logits   : 2 * C * in_bytes
    #   2x double-buffered targets  : 2 * 4
    #   ~4 live f32 (C, tile) temps : 4 * 4 * C   (astype, x-m, exp, select)
    #   a handful of (1, tile) rows : ~8 * 4
    bytes_per_lane = 2 * C * in_bytes + 2 * 4 + 4 * 4 * C + 8 * 4
    cap = max(128, (tile_budget // bytes_per_lane) // 128 * 128)

    tile_hw = min(cap, pl.cdiv(HW, 128) * 128)
    if max_tile_hw is not None:
        tile_hw = min(tile_hw, max(128, (max_tile_hw // 128) * 128))
    tile_hw = int(max(128, tile_hw))

    n_hw_tiles = pl.cdiv(HW, tile_hw)
    # Second parallel axis over spatial chunks so both v7x TensorCores get
    # work even at N == 1 on this memory-bound kernel.
    n_chunks = 1 if N >= 2 else min(2, n_hw_tiles)
    n_inner = pl.cdiv(n_hw_tiles, n_chunks)
    last_tile = n_hw_tiles - 1

    def _tile_idx(c, h):
        # clamp the (fully masked in-kernel) padded tiles of the last chunk
        return jnp.minimum(c * n_inner + h, last_tile)

    grid = (N, n_chunks, n_inner)

    out_shape = (
        jax.ShapeDtypeStruct((N, n_chunks, 1, 1), jnp.float32),   # loss sums
        jax.ShapeDtypeStruct((N, n_chunks, 1, 1), jnp.float32),   # valid counts
    )
    out_spec = pl.BlockSpec((None, None, 1, 1), lambda n, c, h: (n, c, 0, 0))

    loss_sums, counts = pl.pallas_call(
        functools.partial(_ce_kernel, hw=HW),
        out_shape=out_shape,
        grid_spec=pltpu.PrefetchScalarGridSpec(
            num_scalar_prefetch=0,
            grid=grid,
            in_specs=[
                pl.BlockSpec((None, C, tile_hw),
                             lambda n, c, h: (n, 0, _tile_idx(c, h))),
                pl.BlockSpec((None, 1, tile_hw),
                             lambda n, c, h: (n, 0, _tile_idx(c, h))),
            ],
            out_specs=[out_spec, out_spec],
        ),
        compiler_params=pltpu.CompilerParams(
            dimension_semantics=("parallel", "parallel", "arbitrary"),
            vmem_limit_bytes=vmem_limit,
        ),
    )(logits, tgt)

    return jnp.sum(loss_sums) / jnp.sum(counts)


def _reference_ce(preds, targets):
    # pure-JAX reference == torch.nn.functional.cross_entropy (mean reduction,
    # targets outside [0, C) ignored)
    N, C, H, W = preds.shape
    logits = jnp.transpose(preds, (0, 2, 3, 1)).reshape(-1, C).astype(jnp.float32)
    t = targets.reshape(-1)
    valid = (t >= 0) & (t < C)
    t_safe = jnp.where(valid, t, 0)
    logp = jax.nn.log_softmax(logits, axis=-1)
    nll = -jnp.take_along_axis(logp, t_safe[:, None], axis=-1)[:, 0]
    return jnp.sum(jnp.where(valid, nll, 0.0)) / jnp.sum(valid.astype(jnp.float32))


if __name__ == "__main__":
    key = jax.random.PRNGKey(0)
    k1, k2, k3, k4, k5, k6 = jax.random.split(key, 6)

    # ---- test 1: nominal small shape, f32, single tile ---------------------
    N, C, H, W = 2, 4, 16, 16
    preds = jax.random.normal(k1, (N, C, H, W), dtype=jnp.float32)
    targets = jax.random.randint(k2, (N, H, W), 0, C, dtype=jnp.int32)
    loss = cross_entropy_loss(preds, targets)
    jax.block_until_ready(loss)
    ref = _reference_ce(preds, targets)
    assert jnp.allclose(loss, ref, rtol=2e-5, atol=2e-5), (loss, ref)

    # ---- test 2: odd C, ragged tiles, 2 spatial chunks, ignore labels ------
    N2, C2, H2, W2 = 1, 5, 20, 20
    preds2 = jax.random.normal(k3, (N2, C2, H2, W2), dtype=jnp.float32)
    targets2 = jax.random.randint(k4, (N2, H2, W2), 0, C2, dtype=jnp.int32)
    targets2 = targets2.at[0, 0, 0:5].set(255)       # segmentation ignore
    targets2 = targets2.at[0, 3, 2:6].set(-100)      # PyTorch ignore_index
    loss2 = cross_entropy_loss(preds2, targets2, max_tile_hw=128)
    jax.block_until_ready(loss2)
    ref2 = _reference_ce(preds2, targets2)
    assert jnp.allclose(loss2, ref2, rtol=2e-5, atol=2e-5), (loss2, ref2)

    # ---- test 3: bf16 logits consumed directly (halved HBM traffic) --------
    N3, C3, H3, W3 = 1, 8, 16, 16
    preds3 = jax.random.normal(k5, (N3, C3, H3, W3), jnp.float32).astype(jnp.bfloat16)
    targets3 = jax.random.randint(k6, (N3, H3, W3), 0, C3, dtype=jnp.int32)
    loss3 = cross_entropy_loss(preds3, targets3)
    jax.block_until_ready(loss3)
    ref3 = _reference_ce(preds3, targets3)
    assert jnp.allclose(loss3, ref3, rtol=2e-5, atol=2e-5), (loss3, ref3)

    print("KERNEL_OK")
</pallas_src>

<mosaic_0001>
module attributes {stable_mosaic.version = 11 : i64} {
  func.func @_ce_kernel(%arg0: i32, %arg1: i32, %arg2: i32, %arg3: memref<1x4x256xf32, #tpu.memory_space<vmem>>, %arg4: memref<1x1x256xi32, #tpu.memory_space<vmem>>, %arg5: memref<1x1x1x1xf32, #tpu.memory_space<vmem>>, %arg6: memref<1x1x1x1xf32, #tpu.memory_space<vmem>>) attributes {dimension_semantics = [#tpu.dimension_semantics<parallel>, #tpu.dimension_semantics<parallel>, #tpu.dimension_semantics<arbitrary>], iteration_bounds = array<i64: 2, 1, 1>, scalar_prefetch = 0 : i64, scratch_operands = 0 : i64, tpu.core_type = #tpu.core_type<tc>, window_params = [{transform_indices = @transform_0, window_bounds = array<i64: 1, 4, 256>}, {transform_indices = @transform_1, window_bounds = array<i64: 1, 1, 256>}, {transform_indices = @transform_2, window_bounds = array<i64: 1, 1, 1, 1>}, {transform_indices = @transform_3, window_bounds = array<i64: 1, 1, 1, 1>}]} {
    %c0_i32 = arith.constant 0 : i32
    %0 = arith.cmpi eq, %arg2, %c0_i32 : i32
    %1 = arith.extui %0 : i1 to i32
    %c0_i32_0 = arith.constant 0 : i32
    %2 = arith.cmpi ne, %1, %c0_i32_0 : i32
    scf.if %2 {
      %cst_30 = arith.constant 0.000000e+00 : f32
      %59 = vector.broadcast %cst_30 : f32 to vector<1x1xf32>
      %c0_31 = arith.constant 0 : index
      %c0_32 = arith.constant 0 : index
      %c0_33 = arith.constant 0 : index
      %c0_34 = arith.constant 0 : index
      %60 = vector.load %arg5[%c0_31, %c0_32, %c0_33, %c0_34] : memref<1x1x1x1xf32, #tpu.memory_space<vmem>>, vector<1x1x1x1xf32>
      %61 = vector.shape_cast %60 : vector<1x1x1x1xf32> to vector<1x1xf32>
      %62 = vector.shape_cast %59 : vector<1x1xf32> to vector<1x1x1x1xf32>
      tpu.vector_store %arg5[%c0_31, %c0_32, %c0_33, %c0_34], %62 {strides = array<i32>} : memref<1x1x1x1xf32, #tpu.memory_space<vmem>>, vector<1x1x1x1xf32>,
      %cst_35 = arith.constant 0.000000e+00 : f32
      %63 = vector.broadcast %cst_35 : f32 to vector<1x1xf32>
      %c0_36 = arith.constant 0 : index
      %c0_37 = arith.constant 0 : index
      %c0_38 = arith.constant 0 : index
      %c0_39 = arith.constant 0 : index
      %64 = vector.load %arg6[%c0_36, %c0_37, %c0_38, %c0_39] : memref<1x1x1x1xf32, #tpu.memory_space<vmem>>, vector<1x1x1x1xf32>
      %65 = vector.shape_cast %64 : vector<1x1x1x1xf32> to vector<1x1xf32>
      %66 = vector.shape_cast %63 : vector<1x1xf32> to vector<1x1x1x1xf32>
      tpu.vector_store %arg6[%c0_36, %c0_37, %c0_38, %c0_39], %66 {strides = array<i32>} : memref<1x1x1x1xf32, #tpu.memory_space<vmem>>, vector<1x1x1x1xf32>,
    } else {
    }
    %c0 = arith.constant 0 : index
    %c0_1 = arith.constant 0 : index
    %c0_2 = arith.constant 0 : index
    %3 = vector.load %arg3[%c0, %c0_1, %c0_2] : memref<1x4x256xf32, #tpu.memory_space<vmem>>, vector<1x4x256xf32>
    %4 = vector.shape_cast %3 : vector<1x4x256xf32> to vector<4x256xf32>
    %c0_3 = arith.constant 0 : index
    %c0_4 = arith.constant 0 : index
    %c0_5 = arith.constant 0 : index
    %5 = vector.load %arg4[%c0_3, %c0_4, %c0_5] : memref<1x1x256xi32, #tpu.memory_space<vmem>>, vector<1x1x256xi32>
    %6 = vector.shape_cast %5 : vector<1x1x256xi32> to vector<1x256xi32>
    %cst = arith.constant dense<0xFF800000> : vector<256xf32>
    %7 = vector.multi_reduction <maximumf>, %4, %cst [0] : vector<4x256xf32> to vector<256xf32>
    %8 = vector.shape_cast %7 : vector<256xf32> to vector<1x256xf32>
    %9 = vector.broadcast %8 : vector<1x256xf32> to vector<4x256xf32>
    %10 = arith.subf %4, %9 : vector<4x256xf32>
    %11 = math.exp %10 : vector<4x256xf32>
    %cst_6 = arith.constant dense<0.000000e+00> : vector<256xf32>
    %12 = vector.multi_reduction <add>, %11, %cst_6 [0] : vector<4x256xf32> to vector<256xf32>
    %13 = vector.shape_cast %12 : vector<256xf32> to vector<1x256xf32>
    %14 = math.log %13 : vector<1x256xf32>
    %15 = arith.addf %8, %14 : vector<1x256xf32>
    %16 = tpu.iota {dimensions = array<i32: 0>} : vector<4x1xi32>
    %17 = vector.broadcast %16 : vector<4x1xi32> to vector<4x256xi32>
    %18 = vector.broadcast %6 : vector<1x256xi32> to vector<4x256xi32>
    %19 = arith.cmpi eq, %17, %18 : vector<4x256xi32>
    %cst_7 = arith.constant 0.000000e+00 : f32
    %20 = vector.broadcast %cst_7 : f32 to vector<4x256xf32>
    %21 = arith.select %19, %4, %20 : vector<4x256xi1>, vector<4x256xf32>
    %cst_8 = arith.constant dense<0.000000e+00> : vector<256xf32>
    %22 = vector.multi_reduction <add>, %21, %cst_8 [0] : vector<4x256xf32> to vector<256xf32>
    %23 = vector.shape_cast %22 : vector<256xf32> to vector<1x256xf32>
    %c1_i32 = arith.constant 1 : i32
    %24 = arith.muli %arg1, %c1_i32 : i32
    %25 = arith.addi %24, %arg2 : i32
    %26 = tpu.iota {dimensions = array<i32: 1>} : vector<1x256xi32>
    %c256_i32 = arith.constant 256 : i32
    %27 = arith.muli %25, %c256_i32 : i32
    %28 = vector.broadcast %27 : i32 to vector<1x256xi32>
    %29 = arith.addi %26, %28 : vector<1x256xi32>
    %c256_i32_9 = arith.constant 256 : i32
    %30 = vector.broadcast %c256_i32_9 : i32 to vector<1x256xi32>
    %31 = arith.cmpi slt, %29, %30 : vector<1x256xi32>
    %c0_i32_10 = arith.constant 0 : i32
    %32 = vector.broadcast %c0_i32_10 : i32 to vector<1x256xi32>
    %33 = arith.cmpi sge, %6, %32 : vector<1x256xi32>
    %34 = arith.andi %31, %33 : vector<1x256xi1>
    %c4_i32 = arith.constant 4 : i32
    %35 = vector.broadcast %c4_i32 : i32 to vector<1x256xi32>
    %36 = arith.cmpi slt, %6, %35 : vector<1x256xi32>
    %37 = arith.andi %34, %36 : vector<1x256xi1>
    %38 = arith.subf %15, %23 : vector<1x256xf32>
    %cst_11 = arith.constant 0.000000e+00 : f32
    %39 = vector.broadcast %cst_11 : f32 to vector<1x256xf32>
    %40 = arith.select %37, %38, %39 : vector<1x256xi1>, vector<1x256xf32>
    %c0_12 = arith.constant 0 : index
    %c0_13 = arith.constant 0 : index
    %c0_14 = arith.constant 0 : index
    %c0_15 = arith.constant 0 : index
    %41 = vector.load %arg5[%c0_12, %c0_13, %c0_14, %c0_15] : memref<1x1x1x1xf32, #tpu.memory_space<vmem>>, vector<1x1x1x1xf32>
    %42 = vector.shape_cast %41 : vector<1x1x1x1xf32> to vector<1x1xf32>
    %cst_16 = arith.constant dense<0.000000e+00> : vector<1xf32>
    %43 = vector.multi_reduction <add>, %40, %cst_16 [1] : vector<1x256xf32> to vector<1xf32>
    %44 = vector.shape_cast %43 : vector<1xf32> to vector<1x1xf32>
    %45 = arith.addf %42, %44 : vector<1x1xf32>
    %c0_17 = arith.constant 0 : index
    %c0_18 = arith.constant 0 : index
    %c0_19 = arith.constant 0 : index
    %c0_20 = arith.constant 0 : index
    %46 = vector.load %arg5[%c0_17, %c0_18, %c0_19, %c0_20] : memref<1x1x1x1xf32, #tpu.memory_space<vmem>>, vector<1x1x1x1xf32>
    %47 = vector.shape_cast %46 : vector<1x1x1x1xf32> to vector<1x1xf32>
    %48 = vector.shape_cast %45 : vector<1x1xf32> to vector<1x1x1x1xf32>
    tpu.vector_store %arg5[%c0_17, %c0_18, %c0_19, %c0_20], %48 {strides = array<i32>} : memref<1x1x1x1xf32, #tpu.memory_space<vmem>>, vector<1x1x1x1xf32>,
    %c0_21 = arith.constant 0 : index
    %c0_22 = arith.constant 0 : index
    %c0_23 = arith.constant 0 : index
    %c0_24 = arith.constant 0 : index
    %49 = vector.load %arg6[%c0_21, %c0_22, %c0_23, %c0_24] : memref<1x1x1x1xf32, #tpu.memory_space<vmem>>, vector<1x1x1x1xf32>
    %50 = vector.shape_cast %49 : vector<1x1x1x1xf32> to vector<1x1xf32>
    %51 = arith.extui %37 : vector<1x256xi1> to vector<1x256xi32>
    %52 = arith.sitofp %51 : vector<1x256xi32> to vector<1x256xf32>
    %cst_25 = arith.constant dense<0.000000e+00> : vector<1xf32>
    %53 = vector.multi_reduction <add>, %52, %cst_25 [1] : vector<1x256xf32> to vector<1xf32>
    %54 = vector.shape_cast %53 : vector<1xf32> to vector<1x1xf32>
    %55 = arith.addf %50, %54 : vector<1x1xf32>
    %c0_26 = arith.constant 0 : index
    %c0_27 = arith.constant 0 : index
    %c0_28 = arith.constant 0 : index
    %c0_29 = arith.constant 0 : index
    %56 = vector.load %arg6[%c0_26, %c0_27, %c0_28, %c0_29] : memref<1x1x1x1xf32, #tpu.memory_space<vmem>>, vector<1x1x1x1xf32>
    %57 = vector.shape_cast %56 : vector<1x1x1x1xf32> to vector<1x1xf32>
    %58 = vector.shape_cast %55 : vector<1x1xf32> to vector<1x1x1x1xf32>
    tpu.vector_store %arg6[%c0_26, %c0_27, %c0_28, %c0_29], %58 {strides = array<i32>} : memref<1x1x1x1xf32, #tpu.memory_space<vmem>>, vector<1x1x1x1xf32>,
    return
  }
  func.func @transform_0(%arg0: i32, %arg1: i32, %arg2: i32) -> (i32, i32, i32) {
    %c1_i32 = arith.constant 1 : i32
    %0 = arith.muli %arg1, %c1_i32 : i32
    %1 = arith.addi %0, %arg2 : i32
    %c0_i32 = arith.constant 0 : i32
    %2 = arith.minsi %1, %c0_i32 : i32
    %c0_i32_0 = arith.constant 0 : i32
    %c0_i32_1 = arith.constant 0 : i32
    return %arg0, %c0_i32_0, %2 : i32, i32, i32
  }
  func.func @transform_1(%arg0: i32, %arg1: i32, %arg2: i32) -> (i32, i32, i32) {
    %c1_i32 = arith.constant 1 : i32
    %0 = arith.muli %arg1, %c1_i32 : i32
    %1 = arith.addi %0, %arg2 : i32
    %c0_i32 = arith.constant 0 : i32
    %2 = arith.minsi %1, %c0_i32 : i32
    %c0_i32_0 = arith.constant 0 : i32
    %c0_i32_1 = arith.constant 0 : i32
    return %arg0, %c0_i32_0, %2 : i32, i32, i32
  }
  func.func @transform_2(%arg0: i32, %arg1: i32, %arg2: i32) -> (i32, i32, i32, i32) {
    %c0_i32 = arith.constant 0 : i32
    %c0_i32_0 = arith.constant 0 : i32
    %c0_i32_1 = arith.constant 0 : i32
    return %arg0, %arg1, %c0_i32, %c0_i32_0 : i32, i32, i32, i32
  }
  func.func @transform_3(%arg0: i32, %arg1: i32, %arg2: i32) -> (i32, i32, i32, i32) {
    %c0_i32 = arith.constant 0 : i32
    %c0_i32_0 = arith.constant 0 : i32
    %c0_i32_1 = arith.constant 0 : i32
    return %arg0, %arg1, %c0_i32, %c0_i32_0 : i32, i32, i32, i32
  }
}

</mosaic_0001>

<bundles_post_ra>
// kernel: tpu_custom_call.1
= control target key start
LH: loop header
LB: loop body
LE: loop exit
PB: predicated region body
PF: predicated region fallthrough
CT: control target
= control target key end

     0   :  { %9 = vsyncpa [#allocation3], 0  ;;  %s972_s0 = inlined_call_operand.hbm [shape: f32[2,4,256], index: 0, kind: input, shape index: {}]   ;;  %s973_s1 = inlined_call_operand.hbm [shape: s32[2,1,256], index: 1, kind: input, shape index: {}]   ;;  %s974_s2 = inlined_call_operand.vmem [shape: f32[2,1,1,1], index: 2, kind: output, shape index: {0}]   ;;  %s975_s3 = inlined_call_operand.vmem [shape: f32[2,1,1,1], index: 3, kind: output, shape index: {1}]  }
   0x1   :  { %11 = vsyncpa [#allocation3 + $0x1], 0 }
   0x2   :  { %12 = vsyncpa [#allocation5], 0 }
   0x3   :  { %14 = vsyncpa [#allocation5 + $0x1], 0  ;;  %s813_s12 = smov 0   ;;  %s815_s13 = smov 0  }
   0x4   :  { %s817_s14 = smov 0   ;;  %s819_s15 = smov 0  }
   0x5   :  { %s821_s16 = smov 0   ;;  %s823_s17 = smov 0  }
   0x6 LB: > { %s590_s18 = sadd.s32 4294967295, %s789_s17   ;;  %s39_s19 = sadd.s32 1, %s785_s16  ;;  %s789_s17 = sphi %s823_s17, %s20_s17   ;;  %s785_s16 = sphi %s821_s16, %s989_s16   ;;  %s781_s15 = sphi %s819_s15, %s988_s15   ;;  %s777_s14 = sphi %s817_s14, %s987_s14   ;;  %s773_s13 = sphi %s815_s13, %s986_s13   ;;  %s769_s12 = sphi %s813_s12, %s985_s12  }
   0x7   : > { %p41_p0 = scmp.ge.s32.totalorder %s39_s19, 2  ;;  %s54_s20 = sadd.s32 1, %s777_s14 }
   0x8   : > { %p61_p1 = scmp.ne.s32.totalorder %s777_s14, %s773_s13  ;;  %p62_p2 = scmp.eq.s32.totalorder %s789_s17, 0 }
   0x9   : > { %s991_s19 = smov (%p41_p0, %s39_s19), 0  ;;  %p67_p4 = scmp.ne.s32.totalorder %s773_s13, %s769_s12 }
   0xa   : > { %p849_p3 = por %p62_p2, %p61_p1  ;;  %s49_s22 = ssub.s32 %s785_s16, %s991_s19 }
   0xb   : > { %p68_p5 = scmp.eq.s32.totalorder %s590_s18, 0  ;;  %p52_p6 = scmp.eq.s32.totalorder %s49_s22, 0 }
   0xc   : > { %p618_p8 = scmp.lt.s32.totalorder %s789_s17, 2  ;;  %s181_s25 = sand.u32 1, %s777_s14  }
   0xd   : > { %p856_p7 = por %p68_p5, %p67_p4  ;;  %s606_s26 = sshll.u32 %s785_s16, 3 }
   0xe   : > { %s862_s24 = scalar_select %p52_p6, %s777_s14, %s54_s20  }
   0xf   : > { %s594_s27 = sshll.u32 %s181_s25, 3  ;;  %s195_s30 = scalar_lea.hbm %s972_s0, %s606_s26 }
  0x10   : > { %s197_s4 = sshll.u32 %s195_s30, 4  ;;  %s185_s5 = scalar_lea.vmem [#allocation2], %s594_s27  ;;  %s198_s4 = int_to_ptr.hbm [resolvable:$true] %s197_s4 }
  0x11   : > { %s199_s6 = sshll.u32 %s185_s5, 4  ;;  %p871_p9 = pnand %p618_p8, %p849_p3  ;;  %s200_s6 = int_to_ptr.vmem [resolvable:$true] %s199_s6 }
  0x12   : > { %p599_p10 = scmp.ge.s32.totalorder %s789_s17, 1  ;;  %p228_p11 = scmp.lt.s32.totalorder %s789_s17, 3 }
  0x13   : > { %s597_s8 = sshll.u32 %s181_s25, 1  ;;  %s182_s9 = scalar_lea.sflag [#allocation3], %s181_s25 }
  0x14   : > { %614 = dma.hbm_to_vmem [thread:$0]  (!%p871_p9), %s198_s4, 128, %s200_s6, %s182_s9  }
  0x15   : > { %p229_p12 = pnand %p599_p10, %p228_p11  ;;  %s598_s10 = sshll.u32 %s785_s16, 1 }
  0x16   : > { %s210_s11 = scalar_lea.vmem [#allocation4], %s597_s8  ;;  %s219_s21 = scalar_lea.hbm %s973_s1, %s598_s10 }
  0x17   : > { %s223_s12 = sshll.u32 %s210_s11, 4  ;;  %s221_s22 = sshll.u32 %s219_s21, 4  ;;  %s224_s12 = int_to_ptr.vmem [resolvable:$true] %s223_s12  ;;  %s222_s22 = int_to_ptr.hbm [resolvable:$true] %s221_s22 }
  0x18   : > { %s207_s26 = scalar_lea.sflag [#allocation5], %s181_s25  ;;  %232 = sbr.rel (%p229_p12) target bundleno = 235 (0xeb), region = 28 }
  0x19   : > { %617 = dma.hbm_to_vmem [thread:$0]  (!%p871_p9), %s222_s22, 32, %s224_s12, %s207_s26  }
  0x1a   : > { %s234_s27 = sand.u32 (!%p229_p12), 1, %s773_s13  }
  0x1b   : > { %s600_s28 = sshll.u32 (!%p229_p12), %s234_s27, 3  ;;  %s235_s29 = scalar_lea.sflag (!%p229_p12), [#allocation3], %s234_s27 }
  0x1c   : > { %s238_s30 = scalar_lea.vmem (!%p229_p12), [#allocation2], %s600_s28 }
  0x1d   : > { %760 = dma.done.wait (%p856_p7), %s235_s29, 128  }
  0x1e   : > { %762 = vsyncadd (%p856_p7), %s235_s29, 4294967168  ;;  %s601_s4 = sshll.u32 %s234_s27, 1  ;;  %s245_s5 = scalar_lea.sflag [#allocation5], %s234_s27 }
  0x1f   : > { %s248_s6 = scalar_lea.vmem [#allocation4], %s601_s4 }
  0x20   : > { %764 = dma.done.wait (%p856_p7), %s245_s5, 32  }
  0x21   : > { %766 = vsyncadd (%p856_p7), %s245_s5, 4294967264  ;;  %v311_v0 = vld [vmem:[%s238_s30] sm:$0xff]  ;;  %vm319_vm0 = vcmask 1043456   ;;  %v368_v22 = vlaneseq  ;;  %v312_v23 = vld [vmem:[%s248_s6] sm:$0x3]  ;;  %p292_p13 = scmp.lt.s32.totalorder %s781_s15, 1 }
  0x22   : > { %314 = vst [vmem:[#allocation1] ss:$2 sm:$0xff] %v311_v0  ;;  %v370_v31 = vperm.slane %v312_v23, 0  ;;  %v371_v32 = vperm.slane %v312_v23, 1  ;;  %vm405_vm3 = vcmp.ge.s32.totalorder %v312_v23, 0  ;;  %vm308_vm4 = vcmask 0  }
  0x23   : > { %v369_v28 = vshrl.u32 %v368_v22, 7  ;;  %s993_s15 = smov (!%p292_p13, %s781_s15), 1  ;;  %v791_v47 = vmov 0.0   ;;  %vm413_vm5 = vcmp.lt.s32.totalorder %v312_v23, 4  ;;  %v792_v54 = vmov 0  }
  0x24   : > { %s913_s7 = scalar_lea.vmem %s974_s2, %s993_s15  ;;  %v406_v55 = vsel %vm405_vm3, 1, %v792_v54  ;;  %v414_v56 = vsel %vm413_vm5, 1, %v792_v54  ;;  %s924_s10 = scalar_lea.vmem %s975_s3, %s993_s15  ;;  %vm426_vm12 = vcmask 1040384  }
  0x25   : > { %vm372_vm1 = vcmp.eq.s32.totalorder %v369_v28, %v370_v31  ;;  %vm373_vm2 = vcmp.eq.s32.totalorder %v369_v28, %v371_v32  ;;  %309 = vst.msk [vmem:[%s913_s7] sm:$0x1] %vm308_vm4, %v791_v47  ;;  %v407_v61 = vperm.slane %v406_v55, 0  ;;  %v415_v62 = vperm.slane %v414_v56, 0 }
  0x26   : > { %v408_v63 = vperm.slane %v406_v55, 1  ;;  %310 = vst.msk [vmem:[%s924_s10] sm:$0x1] %vm308_vm4, %v791_v47 }
  0x27   : > { %vm928_vm6 = vcmp.ne.s32.totalorder %v407_v61, 0  ;;  %vm932_vm7 = vcmp.ne.s32.totalorder %v415_v62, 0 }
  0x28   : > { %vm936_vm8 = vcmp.ne.s32.totalorder %v408_v63, 0  ;;  %vm419_vm10 = vmand %vm928_vm6, %vm932_vm7 }
  0x29   : > { %v315_v1 = vld.sshfl [vmem:[#allocation1] sm:$0xff pattern:$0x75316420]  ;;  %v316_v2 = vld.sshfl [vmem:[#allocation1 + $0x8] sm:$0xff pattern:$0x75316420] }
  0x2a   : > { %v320_v3 = vsel %vm319_vm0, %v315_v1, -inf  ;;  %v327_v4 = vsel %vm319_vm0, %v316_v2, -inf }
  0x2b   : > { %v321_v5 = vrot.slane %v320_v3, 4  ;;  %v328_v6 = vrot.slane %v327_v4, 4 }
  0x2d   : > { %v322_v7 = vmax.f32 %v320_v3, %v321_v5  ;;  %v329_v8 = vmax.f32 %v327_v4, %v328_v6 }
  0x2f   : > { %v323_v9 = vrot.slane %v322_v7, 2  ;;  %v330_v10 = vrot.slane %v329_v8, 2 }
  0x31   : > { %v324_v11 = vmax.f32 %v322_v7, %v323_v9  ;;  %v331_v12 = vmax.f32 %v329_v8, %v330_v10 }
  0x33   : > { %v325_v13 = vrot.slane %v324_v11, 1  ;;  %v332_v14 = vrot.slane %v331_v12, 1 }
  0x35   : > { %v896_v15 = vmax.f32 %v324_v11, %v325_v13  ;;  %v898_v16 = vmax.f32 %v331_v12, %v332_v14 }
  0x37   : > { %v336_v17 = vrot.slane %v898_v16, 4 }
  0x39   : > { %v337_v18 = vsel %vm319_vm0, %v896_v15, %v336_v17 }
  0x3a   : > { %v339_v19 = vsub.f32 %v311_v0, %v337_v18 }
  0x3c   : > { %v340_v20 = vmul.f32 1.442695, %v339_v19 }
  0x3e   : > { %669 = vpow2.f32 %v340_v20 }
  0x44   : > { %v670_v21 = vpop.eup %669 }
  0x45   : > { %343 = vst [vmem:[#allocation1] ss:$2 sm:$0xff] %v670_v21  ;;  %v602_v21 = vsel %vm419_vm10, 1.0, %v791_v47 }
  0x46   : > { %v440_v23 = vsel %vm426_vm12, %v602_v21, 0.0 }
  0x4c   : > { %v344_v24 = vld.sshfl [vmem:[#allocation1] sm:$0xff pattern:$0x75316420]  ;;  %v345_v25 = vld.sshfl [vmem:[#allocation1 + $0x8] sm:$0xff pattern:$0x75316420] }
  0x4d   : > { %v348_v26 = vsel %vm319_vm0, %v344_v24, 0.0  ;;  %v355_v27 = vsel %vm319_vm0, %v345_v25, 0.0  ;;  %374 = vst [vmem:[#allocation1] ss:$2 sm:$0xff] %v311_v0  ;;  %v416_v0 = vperm.slane %v414_v56, 1 }
  0x4e   : > { %v349_v29 = vrot.slane %v348_v26, 4  ;;  %v356_v30 = vrot.slane %v355_v27, 4 }
  0x4f   : > { %vm418_vm9 = vcmp.ne.s32.totalorder %v416_v0, 0 }
  0x50   : > { %v350_v33 = vadd.f32 %v349_v29, %v348_v26  ;;  %v357_v34 = vadd.f32 %v356_v30, %v355_v27  ;;  %vm420_vm11 = vmand %vm936_vm8, %vm418_vm9  ;;  %v425_v26 = vld [vmem:[%s913_s7] sm:$0x1] }
  0x51   : > { %v603_v22 = vsel %vm420_vm11, 1.0, %v791_v47  ;;  %v435_v29 = vld [vmem:[%s924_s10] sm:$0x1] }
  0x52   : > { %v351_v35 = vrot.slane %v350_v33, 2  ;;  %v358_v36 = vrot.slane %v357_v34, 2  ;;  %v441_v24 = vsel %vm426_vm12, %v603_v22, 0.0 }
  0x53   : > { %v442_v25 = vadd.f32 %v441_v24, %v440_v23 }
  0x54   : > { %v352_v37 = vadd.f32 %v351_v35, %v350_v33  ;;  %v359_v38 = vadd.f32 %v358_v36, %v357_v34  ;;  %v375_v39 = vld.sshfl [vmem:[#allocation1] sm:$0xff pattern:$0x75316420]  ;;  %v376_v40 = vld.sshfl [vmem:[#allocation1 + $0x8] sm:$0xff pattern:$0x75316420] }
  0x55   : > { %v379_v41 = vsel %vm372_vm1, %v375_v39, 0.0  ;;  %v380_v42 = vsel %vm373_vm2, %v376_v40, 0.0 }
  0x56   : > { %v353_v43 = vrot.slane %v352_v37, 1  ;;  %v360_v44 = vrot.slane %v359_v38, 1  ;;  %v381_v45 = vsel %vm319_vm0, %v379_v41, 0.0  ;;  %v388_v46 = vsel %vm319_vm0, %v380_v42, 0.0 }
  0x57   : > { %v382_v48 = vrot.slane %v381_v45, 4  ;;  %v389_v49 = vrot.slane %v388_v46, 4 }
  0x58   : > { %v354_v50 = vadd.f32 %v353_v43, %v352_v37  ;;  %v361_v51 = vadd.f32 %v360_v44, %v359_v38 }
  0x59   : > { %v383_v52 = vadd.f32 %v382_v48, %v381_v45  ;;  %v390_v53 = vadd.f32 %v389_v49, %v388_v46 }
  0x5a   : > { %671 = vlog2.f32 %v354_v50 }
  0x5b   : > { %673 = vlog2.f32 %v361_v51  ;;  %v384_v57 = vrot.slane %v383_v52, 2  ;;  %v391_v58 = vrot.slane %v390_v53, 2 }
  0x5d   : > { %v385_v59 = vadd.f32 %v384_v57, %v383_v52  ;;  %v392_v60 = vadd.f32 %v391_v58, %v390_v53 }
  0x5f   : > { %v386_v1 = vrot.slane %v385_v59, 1  ;;  %v393_v2 = vrot.slane %v392_v60, 1 }
  0x60   : > { %v672_v3 = vpop.eup %671 }
  0x61   : > { %v674_v4 = vpop.eup %673  ;;  %v363_v5 = vmul.f32 0.6931472, %v672_v3  ;;  %v387_v6 = vadd.f32 %v386_v1, %v385_v59  ;;  %v394_v10 = vadd.f32 %v393_v2, %v392_v60 }
  0x62   : > { %v365_v9 = vmul.f32 0.6931472, %v674_v4 }
  0x63   : > { %v366_v12 = vadd.f32 %v363_v5, %v896_v15 }
  0x64   : > { %v367_v13 = vadd.f32 %v365_v9, %v898_v16 }
  0x65   : > { %v421_v14 = vsub.f32 %v366_v12, %v387_v6 }
  0x66   : > { %v422_v17 = vsub.f32 %v367_v13, %v394_v10 }
  0x67   : > { %v423_v18 = vsel %vm419_vm10, %v421_v14, 0.0 }
  0x68   : > { %v424_v19 = vsel %vm420_vm11, %v422_v17, 0.0  ;;  %v427_v20 = vsel %vm426_vm12, %v423_v18, 0.0 }
  0x69   : > { %v428_v15 = vsel %vm426_vm12, %v424_v19, 0.0 }
  0x6a   : > { %v429_v16 = vadd.f32 %v428_v15, %v427_v20 }
  0x6c   : > { %430 = vadd.xlane.f32.xlu0 %v429_v16 }
  0x74   : > { %443 = vadd.xlane.f32.xlu0 %v442_v25 }
  0xdf   : > { %v431_v27 = vpop.xlane.xlu0 %430 }
  0xe0   : > { %v432_v28 = vadd.f32 %v431_v27, %v425_v26 }
  0xe2   : > { %434 = vst.msk [vmem:[%s913_s7] sm:$0x1] %vm308_vm4, %v432_v28 }
  0xe7   : > { %v444_v30 = vpop.xlane.xlu0 %443 }
  0xe8   : > { %v445_v31 = vadd.f32 %v444_v30, %v435_v29 }
  0xea   : > { %446 = vst.msk [vmem:[%s924_s10] sm:$0x1] %vm308_vm4, %v445_v31 }
  0xeb PF: > { %s20_s17 = sadd.s32 1, %s789_s17   ;;  %s985_s12 = smov %s773_s13 }
  0xec   : > { %p17_p0 = scmp.ge.s32.totalorder %s20_s17, 4   ;;  %s986_s13 = smov %s777_s14 }
  0xed   : > { %s987_s14 = smov %s862_s24  ;;  %s988_s15 = smov %s785_s16 }
  0xee   : > { %s989_s16 = smov %s991_s19  ;;  %19 = sbr.rel (!%p17_p0) target bundleno = 6 (0x6), region = 97 }
  0xf3   :  { %488 = vsyncpa [#allocation3], 1 }
  0xf4   :  { %490 = vsyncpa [#allocation3 + $0x1], 1 }
  0xf5   :  { %491 = vsyncpa [#allocation5], 1 }
  0xf6   :  { %493 = vsyncpa [#allocation5 + $0x1], 1 }

</bundles_post_ra>
